<compile_context>
chip_gen: v6e
topology: v6e:2x2x1
jax: 0.10.0
libtpu: 0.0.40
codegen_flags: <defaults>
</compile_context>

<pallas_src>
import jax
import jax.numpy as jnp
from jax.experimental import pallas as pl
from jax.experimental.pallas import tpu as pltpu


def _attn_readout_kernel(feat_ref, mask_ref, last_ref,
                         wu_ref, wv_ref, bv_ref, we_ref,
                         scale_ref, shift_ref, wout_ref,
                         out_ref):
    feat = feat_ref[...].astype(jnp.float32)       # (TB, S, D)
    mask = mask_ref[...].astype(jnp.float32)       # (TB, S)
    last = last_ref[...].astype(jnp.float32)       # (TB, D)
    wu = wu_ref[...]                               # (D, H)
    wv = wv_ref[...]                               # (D, H)
    bv = bv_ref[...]                               # (1, H)
    we = we_ref[...]                               # (1, H)
    wout = wout_ref[...]                           # (D, OUT)

    tb, s, d = feat.shape
    h = wu.shape[1]

    # --- BatchNorm1d(session_len), eval mode, folded to per-slot scale/shift ---
    scale = scale_ref[...].reshape(1, s, 1)        # (S,1) -> (1,S,1): adds a unit dim, free
    shift = shift_ref[...].reshape(1, s, 1)

    # BN -> *mask -> dropout(identity at eval) -> *mask, fused as one multiply by mask^2.
    # TODO(synk): nn.Dropout(feat_drop) is identity at inference / p=0.0; not implemented.
    mask_sq = mask * mask                          # == mask for {0,1} masks; faithful otherwise
    feat = (feat * scale + shift) * mask_sq[:, :, None]

    # --- fc_u : (TB*S, D) @ (D, H) -> (TB, S, H), then re-mask (as in the reference) ---
    feat_u = jnp.dot(feat.reshape(tb * s, d), wu,
                     preferred_element_type=jnp.float32).reshape(tb, s, h)
    feat_u = feat_u * mask[:, :, None]

    # --- fc_v : (TB, D) @ (D, H) + b -> (TB, H), broadcast over S ---
    feat_v = jnp.dot(last, wv, preferred_element_type=jnp.float32) + bv   # (TB, H)

    # --- sigmoid (EUP) + fc_e (VPU mul + XLU lane-reduce over H) ---
    z = feat_u + feat_v.reshape(tb, 1, h)
    sig = 1.0 / (1.0 + jnp.exp(-z))                # (TB, S, H)
    e = jnp.sum(sig * we.reshape(1, 1, h), axis=-1)   # (TB, S)

    # --- masked softmax over the session axis ---
    e = e + (mask - 1.0) * 2e32
    e_max = jnp.max(e, axis=1, keepdims=True)
    p = jnp.exp(e - e_max)
    denom = jnp.sum(p, axis=1, keepdims=True)
    attn = p * pl.reciprocal(denom, approx=True)      # (TB, S)

    # --- attention-weighted readout (post-softmax mask fused into the weights) + fc_out ---
    w = attn * mask                                   # (TB, S)
    rst = jnp.sum(feat * w[:, :, None], axis=1)       # (TB, D)
    rst = jnp.dot(rst, wout, preferred_element_type=jnp.float32)   # (TB, OUT)
    # TODO(synk): `activation` is None in this configuration; apply in the wrapper if set.
    out_ref[...] = rst.astype(out_ref.dtype)


def attn_readout(feat, last_nodes, mask, params, *, eps=1e-5, block_b=None):
    """Forward pass of AttnReadout (eval mode).

    feat: (B, S, D) float, last_nodes: (B, D) float, mask: (B, S) float (1=valid, 0=pad).
    params: dict with PyTorch-convention weights:
      w_u (H, D), w_v (H, D), b_v (H,), w_e (1, H), w_out (OUT, D),
      bn_gamma/bn_beta/bn_mean/bn_var (S,).
    """
    B, S, D = feat.shape
    w_u, w_v, b_v, w_e, w_out = (params["w_u"], params["w_v"], params["b_v"],
                                 params["w_e"], params["w_out"])
    H = w_u.shape[0]
    OUT = w_out.shape[0]

    # Pick the batch tile: big tiles => fewer grid steps (less per-step overhead); keep the
    # tile sublane-aligned (multiple of 8) unless it covers the whole batch.
    if block_b is None:
        block_b = min(128, B)
    block_b = max(1, min(int(block_b), B))
    if block_b < B:
        block_b = min(((block_b + 7) // 8) * 8, B)

    # Zero-pad ragged batches to a multiple of the tile (padded rows have mask == 0 and are
    # sliced off below; the masked softmax stays finite on all-padded rows).
    Bp = pl.cdiv(B, block_b) * block_b
    if Bp != B:
        pad = Bp - B
        feat = jnp.pad(feat, ((0, pad), (0, 0), (0, 0)))
        last_nodes = jnp.pad(last_nodes, ((0, pad), (0, 0)))
        mask = jnp.pad(mask, ((0, pad), (0, 0)))

    # Fold eval-mode BatchNorm1d(session_len) into per-slot scale/shift (done once, on host).
    inv_std = 1.0 / jnp.sqrt(params["bn_var"].astype(jnp.float32) + eps)
    scale = (params["bn_gamma"].astype(jnp.float32) * inv_std).reshape(S, 1)
    shift = (params["bn_beta"].astype(jnp.float32)
             - params["bn_mean"].astype(jnp.float32)
             * params["bn_gamma"].astype(jnp.float32) * inv_std).reshape(S, 1)

    wu_t = w_u.T.astype(jnp.float32)              # (D, H)
    wv_t = w_v.T.astype(jnp.float32)              # (D, H)
    bv2 = b_v.reshape(1, H).astype(jnp.float32)   # (1, H)
    we2 = w_e.reshape(1, H).astype(jnp.float32)   # (1, H)
    wout_t = w_out.T.astype(jnp.float32)          # (D, OUT)

    grid = (Bp // block_b,)

    out = pl.pallas_call(
        _attn_readout_kernel,
        out_shape=jax.ShapeDtypeStruct((Bp, OUT), feat.dtype),
        grid_spec=pltpu.PrefetchScalarGridSpec(
            num_scalar_prefetch=0,
            grid=grid,
            in_specs=[
                pl.BlockSpec((block_b, S, D), lambda i: (i, 0, 0)),   # feat tile
                pl.BlockSpec((block_b, S), lambda i: (i, 0)),         # mask tile
                pl.BlockSpec((block_b, D), lambda i: (i, 0)),         # last_nodes tile
                pl.BlockSpec((D, H), lambda i: (0, 0)),               # w_u^T    (resident)
                pl.BlockSpec((D, H), lambda i: (0, 0)),               # w_v^T    (resident)
                pl.BlockSpec((1, H), lambda i: (0, 0)),               # b_v      (resident)
                pl.BlockSpec((1, H), lambda i: (0, 0)),               # w_e      (resident)
                pl.BlockSpec((S, 1), lambda i: (0, 0)),               # BN scale (resident)
                pl.BlockSpec((S, 1), lambda i: (0, 0)),               # BN shift (resident)
                pl.BlockSpec((D, OUT), lambda i: (0, 0)),             # w_out^T  (resident)
            ],
            out_specs=pl.BlockSpec((block_b, OUT), lambda i: (i, 0)),
        ),
        compiler_params=pltpu.CompilerParams(
            dimension_semantics=("parallel",)),
    )(feat, mask, last_nodes, wu_t, wv_t, bv2, we2, scale, shift, wout_t)

    return out[:B] if Bp != B else out


def _reference(feat, last_nodes, mask, params, eps=1e-5):
    # Pure-JAX reference of the same eval-mode forward (high-precision matmuls).
    hp = jax.lax.Precision.HIGHEST
    gamma, beta_bn = params["bn_gamma"], params["bn_beta"]
    mean, var = params["bn_mean"], params["bn_var"]
    scale = gamma / jnp.sqrt(var + eps)
    shift = beta_bn - mean * scale
    f = feat * scale[None, :, None] + shift[None, :, None]
    m3 = mask[:, :, None]
    f = f * m3
    f = f * m3
    fu = jnp.einsum('bsd,hd->bsh', f, params["w_u"], precision=hp) * m3
    fv = jnp.dot(last_nodes, params["w_v"].T, precision=hp) + params["b_v"]
    sig = jax.nn.sigmoid(fu + fv[:, None, :])
    e = jnp.einsum('bsh,h->bs', sig, params["w_e"][0], precision=hp)
    e = e + (mask - 1.0) * 2e32
    attn = jax.nn.softmax(e, axis=1)
    rst = jnp.sum(f * attn[:, :, None] * m3, axis=1)
    return jnp.dot(rst, params["w_out"].T, precision=hp)


if __name__ == "__main__":
    key = jax.random.PRNGKey(0)
    B, S, D, H, OUT = 16, 8, 32, 32, 16   # batch, session_len, input_dim, hidden_dim, output_dim
    ks = jax.random.split(key, 12)

    feat = jax.random.normal(ks[0], (B, S, D), dtype=jnp.float32)
    last_nodes = jax.random.normal(ks[1], (B, D), dtype=jnp.float32)
    lengths = jax.random.randint(ks[2], (B,), 1, S + 1)
    mask = (jnp.arange(S)[None, :] < lengths[:, None]).astype(jnp.float32)   # (B, S)

    params = {
        "w_u": jax.random.normal(ks[3], (H, D), dtype=jnp.float32) / jnp.sqrt(D),
        "w_v": jax.random.normal(ks[4], (H, D), dtype=jnp.float32) / jnp.sqrt(D),
        "b_v": 0.1 * jax.random.normal(ks[5], (H,), dtype=jnp.float32),
        "w_e": jax.random.normal(ks[6], (1, H), dtype=jnp.float32) / jnp.sqrt(H),
        "w_out": jax.random.normal(ks[7], (OUT, D), dtype=jnp.float32) / jnp.sqrt(D),
        "bn_gamma": 1.0 + 0.1 * jax.random.normal(ks[8], (S,), dtype=jnp.float32),
        "bn_beta": 0.1 * jax.random.normal(ks[9], (S,), dtype=jnp.float32),
        "bn_mean": 0.1 * jax.random.normal(ks[10], (S,), dtype=jnp.float32),
        "bn_var": jax.random.uniform(ks[11], (S,), dtype=jnp.float32, minval=0.5, maxval=1.5),
    }

    ref = _reference(feat, last_nodes, mask, params)

    # Tiled path (2 grid steps of block_b=8).
    out = attn_readout(feat, last_nodes, mask, params, block_b=8)
    out = jax.block_until_ready(out)
    assert out.shape == (B, OUT), out.shape
    assert bool(jnp.all(jnp.isfinite(out)))
    assert jnp.allclose(out, ref, rtol=2e-2, atol=2e-2), float(jnp.max(jnp.abs(out - ref)))

    # Ragged-batch path (B=13 padded to 16 inside the wrapper).
    Bs = 13
    out2 = attn_readout(feat[:Bs], last_nodes[:Bs], mask[:Bs], params, block_b=8)
    out2 = jax.block_until_ready(out2)
    assert out2.shape == (Bs, OUT), out2.shape
    assert jnp.allclose(out2, ref[:Bs], rtol=2e-2, atol=2e-2), \
        float(jnp.max(jnp.abs(out2 - ref[:Bs])))

    print("KERNEL_OK")
</pallas_src>

<mosaic_0001>
module attributes {stable_mosaic.version = 11 : i64} {
  func.func @_attn_readout_kernel(%arg0: i32, %arg1: memref<8x8x32xf32, #tpu.memory_space<vmem>>, %arg2: memref<8x8xf32, #tpu.memory_space<vmem>>, %arg3: memref<8x32xf32, #tpu.memory_space<vmem>>, %arg4: memref<32x32xf32, #tpu.memory_space<vmem>>, %arg5: memref<32x32xf32, #tpu.memory_space<vmem>>, %arg6: memref<1x32xf32, #tpu.memory_space<vmem>>, %arg7: memref<1x32xf32, #tpu.memory_space<vmem>>, %arg8: memref<8x1xf32, #tpu.memory_space<vmem>>, %arg9: memref<8x1xf32, #tpu.memory_space<vmem>>, %arg10: memref<32x16xf32, #tpu.memory_space<vmem>>, %arg11: memref<8x16xf32, #tpu.memory_space<vmem>>) attributes {dimension_semantics = [#tpu.dimension_semantics<parallel>], iteration_bounds = array<i64: 2>, scalar_prefetch = 0 : i64, scratch_operands = 0 : i64, tpu.core_type = #tpu.core_type<tc>, window_params = [{transform_indices = @transform_0, window_bounds = array<i64: 8, 8, 32>}, {transform_indices = @transform_1, window_bounds = array<i64: 8, 8>}, {transform_indices = @transform_2, window_bounds = array<i64: 8, 32>}, {pipeline_mode = #tpu.pipeline_mode<synchronous>, transform_indices = @transform_3, window_bounds = array<i64: 32, 32>}, {pipeline_mode = #tpu.pipeline_mode<synchronous>, transform_indices = @transform_4, window_bounds = array<i64: 32, 32>}, {pipeline_mode = #tpu.pipeline_mode<synchronous>, transform_indices = @transform_5, window_bounds = array<i64: 1, 32>}, {pipeline_mode = #tpu.pipeline_mode<synchronous>, transform_indices = @transform_6, window_bounds = array<i64: 1, 32>}, {pipeline_mode = #tpu.pipeline_mode<synchronous>, transform_indices = @transform_7, window_bounds = array<i64: 8, 1>}, {pipeline_mode = #tpu.pipeline_mode<synchronous>, transform_indices = @transform_8, window_bounds = array<i64: 8, 1>}, {pipeline_mode = #tpu.pipeline_mode<synchronous>, transform_indices = @transform_9, window_bounds = array<i64: 32, 16>}, {transform_indices = @transform_10, window_bounds = array<i64: 8, 16>}]} {
    %c0 = arith.constant 0 : index
    %c0_0 = arith.constant 0 : index
    %c0_1 = arith.constant 0 : index
    %0 = vector.load %arg1[%c0, %c0_0, %c0_1] : memref<8x8x32xf32, #tpu.memory_space<vmem>>, vector<8x8x32xf32>
    %c0_2 = arith.constant 0 : index
    %c0_3 = arith.constant 0 : index
    %1 = vector.load %arg2[%c0_2, %c0_3] : memref<8x8xf32, #tpu.memory_space<vmem>>, vector<8x8xf32>
    %c0_4 = arith.constant 0 : index
    %c0_5 = arith.constant 0 : index
    %2 = vector.load %arg3[%c0_4, %c0_5] : memref<8x32xf32, #tpu.memory_space<vmem>>, vector<8x32xf32>
    %c0_6 = arith.constant 0 : index
    %c0_7 = arith.constant 0 : index
    %3 = vector.load %arg4[%c0_6, %c0_7] : memref<32x32xf32, #tpu.memory_space<vmem>>, vector<32x32xf32>
    %c0_8 = arith.constant 0 : index
    %c0_9 = arith.constant 0 : index
    %4 = vector.load %arg5[%c0_8, %c0_9] : memref<32x32xf32, #tpu.memory_space<vmem>>, vector<32x32xf32>
    %c0_10 = arith.constant 0 : index
    %c0_11 = arith.constant 0 : index
    %5 = vector.load %arg6[%c0_10, %c0_11] : memref<1x32xf32, #tpu.memory_space<vmem>>, vector<1x32xf32>
    %c0_12 = arith.constant 0 : index
    %c0_13 = arith.constant 0 : index
    %6 = vector.load %arg7[%c0_12, %c0_13] : memref<1x32xf32, #tpu.memory_space<vmem>>, vector<1x32xf32>
    %c0_14 = arith.constant 0 : index
    %c0_15 = arith.constant 0 : index
    %7 = vector.load %arg10[%c0_14, %c0_15] : memref<32x16xf32, #tpu.memory_space<vmem>>, vector<32x16xf32>
    %c0_16 = arith.constant 0 : index
    %c0_17 = arith.constant 0 : index
    %8 = vector.load %arg8[%c0_16, %c0_17] : memref<8x1xf32, #tpu.memory_space<vmem>>, vector<8x1xf32>
    %9 = vector.shape_cast %8 : vector<8x1xf32> to vector<1x8x1xf32>
    %c0_18 = arith.constant 0 : index
    %c0_19 = arith.constant 0 : index
    %10 = vector.load %arg9[%c0_18, %c0_19] : memref<8x1xf32, #tpu.memory_space<vmem>>, vector<8x1xf32>
    %11 = vector.shape_cast %10 : vector<8x1xf32> to vector<1x8x1xf32>
    %12 = arith.mulf %1, %1 : vector<8x8xf32>
    %13 = vector.broadcast %9 : vector<1x8x1xf32> to vector<8x8x32xf32>
    %14 = arith.mulf %0, %13 : vector<8x8x32xf32>
    %15 = vector.broadcast %11 : vector<1x8x1xf32> to vector<8x8x32xf32>
    %16 = arith.addf %14, %15 : vector<8x8x32xf32>
    %17 = vector.shape_cast %12 : vector<8x8xf32> to vector<8x8x1xf32>
    %18 = vector.broadcast %17 : vector<8x8x1xf32> to vector<8x8x32xf32>
    %19 = arith.mulf %16, %18 : vector<8x8x32xf32>
    %20 = vector.shape_cast %19 : vector<8x8x32xf32> to vector<64x32xf32>
    %cst = arith.constant dense<0.000000e+00> : vector<64x32xf32>
    %21 = tpu.matmul %20, %3, %cst {dimension_numbers = #tpu.dot_dimension_numbers<[1], [0], [0], [1], [0, 0, 1, 1], [], []>} : vector<64x32xf32>, vector<32x32xf32>, vector<64x32xf32> -> vector<64x32xf32>
    %22 = vector.shape_cast %21 : vector<64x32xf32> to vector<8x8x32xf32>
    %23 = vector.shape_cast %1 : vector<8x8xf32> to vector<8x8x1xf32>
    %24 = vector.broadcast %23 : vector<8x8x1xf32> to vector<8x8x32xf32>
    %25 = arith.mulf %22, %24 : vector<8x8x32xf32>
    %cst_20 = arith.constant dense<0.000000e+00> : vector<8x32xf32>
    %26 = tpu.matmul %2, %4, %cst_20 {dimension_numbers = #tpu.dot_dimension_numbers<[1], [0], [0], [1], [0, 0, 1, 1], [], []>} : vector<8x32xf32>, vector<32x32xf32>, vector<8x32xf32> -> vector<8x32xf32>
    %27 = vector.broadcast %5 : vector<1x32xf32> to vector<8x32xf32>
    %28 = arith.addf %26, %27 : vector<8x32xf32>
    %29 = vector.shape_cast %28 : vector<8x32xf32> to vector<8x1x32xf32>
    %30 = vector.broadcast %29 : vector<8x1x32xf32> to vector<8x8x32xf32>
    %31 = arith.addf %25, %30 : vector<8x8x32xf32>
    %cst_21 = arith.constant 0.000000e+00 : f32
    %32 = vector.broadcast %cst_21 : f32 to vector<8x8x32xf32>
    %33 = arith.subf %32, %31 : vector<8x8x32xf32>
    %34 = math.exp %33 : vector<8x8x32xf32>
    %cst_22 = arith.constant 1.000000e+00 : f32
    %35 = vector.broadcast %cst_22 : f32 to vector<8x8x32xf32>
    %36 = arith.addf %35, %34 : vector<8x8x32xf32>
    %cst_23 = arith.constant 1.000000e+00 : f32
    %37 = vector.broadcast %cst_23 : f32 to vector<8x8x32xf32>
    %38 = arith.divf %37, %36 : vector<8x8x32xf32>
    %39 = vector.shape_cast %6 : vector<1x32xf32> to vector<1x1x32xf32>
    %40 = vector.broadcast %39 : vector<1x1x32xf32> to vector<8x8x32xf32>
    %41 = arith.mulf %38, %40 : vector<8x8x32xf32>
    %cst_24 = arith.constant dense<0.000000e+00> : vector<8x8xf32>
    %42 = vector.multi_reduction <add>, %41, %cst_24 [2] : vector<8x8x32xf32> to vector<8x8xf32>
    %cst_25 = arith.constant 1.000000e+00 : f32
    %43 = vector.broadcast %cst_25 : f32 to vector<8x8xf32>
    %44 = arith.subf %1, %43 : vector<8x8xf32>
    %cst_26 = arith.constant 2.000000e+32 : f32
    %45 = vector.broadcast %cst_26 : f32 to vector<8x8xf32>
    %46 = arith.mulf %44, %45 : vector<8x8xf32>
    %47 = arith.addf %42, %46 : vector<8x8xf32>
    %cst_27 = arith.constant dense<0xFF800000> : vector<8xf32>
    %48 = vector.multi_reduction <maximumf>, %47, %cst_27 [1] : vector<8x8xf32> to vector<8xf32>
    %49 = vector.shape_cast %48 : vector<8xf32> to vector<8x1xf32>
    %50 = vector.broadcast %49 : vector<8x1xf32> to vector<8x8xf32>
    %51 = arith.subf %47, %50 : vector<8x8xf32>
    %52 = math.exp %51 : vector<8x8xf32>
    %cst_28 = arith.constant dense<0.000000e+00> : vector<8xf32>
    %53 = vector.multi_reduction <add>, %52, %cst_28 [1] : vector<8x8xf32> to vector<8xf32>
    %54 = vector.shape_cast %53 : vector<8xf32> to vector<8x1xf32>
    %55 = tpu.reciprocal %54 {approx = true} : vector<8x1xf32> -> vector<8x1xf32>
    %56 = vector.broadcast %55 : vector<8x1xf32> to vector<8x8xf32>
    %57 = arith.mulf %52, %56 : vector<8x8xf32>
    %58 = arith.mulf %57, %1 : vector<8x8xf32>
    %59 = vector.shape_cast %58 : vector<8x8xf32> to vector<8x8x1xf32>
    %60 = vector.broadcast %59 : vector<8x8x1xf32> to vector<8x8x32xf32>
    %61 = arith.mulf %19, %60 : vector<8x8x32xf32>
    %cst_29 = arith.constant dense<0.000000e+00> : vector<8x32xf32>
    %62 = vector.multi_reduction <add>, %61, %cst_29 [1] : vector<8x8x32xf32> to vector<8x32xf32>
    %cst_30 = arith.constant dense<0.000000e+00> : vector<8x16xf32>
    %63 = tpu.matmul %62, %7, %cst_30 {dimension_numbers = #tpu.dot_dimension_numbers<[1], [0], [0], [1], [0, 0, 1, 1], [], []>} : vector<8x32xf32>, vector<32x16xf32>, vector<8x16xf32> -> vector<8x16xf32>
    %c0_31 = arith.constant 0 : index
    %c0_32 = arith.constant 0 : index
    %64 = vector.load %arg11[%c0_31, %c0_32] : memref<8x16xf32, #tpu.memory_space<vmem>>, vector<8x16xf32>
    tpu.vector_store %arg11[%c0_31, %c0_32], %63 {strides = array<i32>} : memref<8x16xf32, #tpu.memory_space<vmem>>, vector<8x16xf32>,
    return
  }
  func.func @transform_0(%arg0: i32) -> (i32, i32, i32) {
    %c0_i32 = arith.constant 0 : i32
    %c0_i32_0 = arith.constant 0 : i32
    %c0_i32_1 = arith.constant 0 : i32
    return %arg0, %c0_i32, %c0_i32_0 : i32, i32, i32
  }
  func.func @transform_1(%arg0: i32) -> (i32, i32) {
    %c0_i32 = arith.constant 0 : i32
    %c0_i32_0 = arith.constant 0 : i32
    return %arg0, %c0_i32 : i32, i32
  }
  func.func @transform_2(%arg0: i32) -> (i32, i32) {
    %c0_i32 = arith.constant 0 : i32
    %c0_i32_0 = arith.constant 0 : i32
    return %arg0, %c0_i32 : i32, i32
  }
  func.func @transform_3(%arg0: i32) -> (i32, i32) {
    %c0_i32 = arith.constant 0 : i32
    %c0_i32_0 = arith.constant 0 : i32
    %c0_i32_1 = arith.constant 0 : i32
    return %c0_i32, %c0_i32_0 : i32, i32
  }
  func.func @transform_4(%arg0: i32) -> (i32, i32) {
    %c0_i32 = arith.constant 0 : i32
    %c0_i32_0 = arith.constant 0 : i32
    %c0_i32_1 = arith.constant 0 : i32
    return %c0_i32, %c0_i32_0 : i32, i32
  }
  func.func @transform_5(%arg0: i32) -> (i32, i32) {
    %c0_i32 = arith.constant 0 : i32
    %c0_i32_0 = arith.constant 0 : i32
    %c0_i32_1 = arith.constant 0 : i32
    return %c0_i32, %c0_i32_0 : i32, i32
  }
  func.func @transform_6(%arg0: i32) -> (i32, i32) {
    %c0_i32 = arith.constant 0 : i32
    %c0_i32_0 = arith.constant 0 : i32
    %c0_i32_1 = arith.constant 0 : i32
    return %c0_i32, %c0_i32_0 : i32, i32
  }
  func.func @transform_7(%arg0: i32) -> (i32, i32) {
    %c0_i32 = arith.constant 0 : i32
    %c0_i32_0 = arith.constant 0 : i32
    %c0_i32_1 = arith.constant 0 : i32
    return %c0_i32, %c0_i32_0 : i32, i32
  }
  func.func @transform_8(%arg0: i32) -> (i32, i32) {
    %c0_i32 = arith.constant 0 : i32
    %c0_i32_0 = arith.constant 0 : i32
    %c0_i32_1 = arith.constant 0 : i32
    return %c0_i32, %c0_i32_0 : i32, i32
  }
  func.func @transform_9(%arg0: i32) -> (i32, i32) {
    %c0_i32 = arith.constant 0 : i32
    %c0_i32_0 = arith.constant 0 : i32
    %c0_i32_1 = arith.constant 0 : i32
    return %c0_i32, %c0_i32_0 : i32, i32
  }
  func.func @transform_10(%arg0: i32) -> (i32, i32) {
    %c0_i32 = arith.constant 0 : i32
    %c0_i32_0 = arith.constant 0 : i32
    return %arg0, %c0_i32 : i32, i32
  }
}

</mosaic_0001>

<bundles_post_ra>
// kernel: tpu_custom_call.1
= control target key start
LH: loop header
LB: loop body
LE: loop exit
PB: predicated region body
PF: predicated region fallthrough
CT: control target
= control target key end

     0   :  { %s2691_s0 = inlined_call_operand.hbm [shape: f32[16,8,32], index: 0, kind: input, shape index: {}]   ;;  %s2692_s1 = inlined_call_operand.vmem [shape: f32[16,8], index: 1, kind: input, shape index: {}]   ;;  %s2693_s2 = inlined_call_operand.hbm [shape: f32[16,32], index: 2, kind: input, shape index: {}]   ;;  %s2694_s3 = inlined_call_operand.vmem [shape: f32[32,32], index: 3, kind: input, shape index: {}]   ;;  %s2695_s4 = inlined_call_operand.vmem [shape: f32[32,32], index: 4, kind: input, shape index: {}]   ;;  %s2696_s5 = inlined_call_operand.vmem [shape: f32[1,32], index: 5, kind: input, shape index: {}]   ;;  %s2697_s6 = inlined_call_operand.vmem [shape: f32[1,32], index: 6, kind: input, shape index: {}]   ;;  %s2698_s7 = inlined_call_operand.vmem [shape: f32[8,1], index: 7, kind: input, shape index: {}]   ;;  %s2699_s8 = inlined_call_operand.vmem [shape: f32[8,1], index: 8, kind: input, shape index: {}]   ;;  %s2700_s9 = inlined_call_operand.vmem [shape: f32[32,16], index: 9, kind: input, shape index: {}]   ;;  %s2701_s10 = inlined_call_operand.hbm [shape: f32[16,16], index: 10, kind: output, shape index: {}]  }
   0x1   :  { %2710 = sst [smem:[#allocation16_spill]] %s2691_s0 }
   0x2   :  { %2711 = sst [smem:[#allocation17_spill]] %s2701_s10 }
   0x3   :  { %15 = vsyncpa [#allocation3], 0 }
   0x4   :  { %17 = vsyncpa [#allocation3 + $0x1], 0 }
   0x5   :  { %18 = vsyncpa [#allocation6], 0 }
   0x6   :  { %20 = vsyncpa [#allocation6 + $0x1], 0 }
   0x7   :  { %21 = vsyncpa [#allocation4], 0 }
   0x8   :  { %23 = vsyncpa [#allocation4 + $0x1], 0  ;;  %s2136_s13 = smov 0   ;;  %s2138_s14 = smov 0  }
   0x9   :  { %s2140_s15 = smov 0   ;;  %s2142_s16 = smov 0  }
   0xa LB: > { %2712 = sst [smem:[#allocation11_spill]] %s2058_s13  ;;  %s2157_s17 = sadd.s32 4294967295, %s2070_s16   ;;  %s2070_s16 = sphi %s2142_s16, %s2733_s16   ;;  %s2066_s15 = sphi %s2140_s15, %s2735_s15   ;;  %s2062_s14 = sphi %s2138_s14, %s2737_s14   ;;  %s2058_s13 = sphi %s2136_s13, %s2736_s13  }
   0xb   : > { %2713 = sst [smem:[#allocation12_spill]] %s2066_s15  ;;  %s1742_s18 = sadd.s32 4294967294, %s2070_s16  }
   0xc   : > { %s2161_s19 = sadd.s32 1, %s2070_s16   ;;  %s36_s20 = sadd.s32 1, %s2066_s15 }
   0xd   : > { %2714 = sst [smem:[#allocation13_spill]] %s2161_s19  ;;  %s33_s21 = ssub.s32 %s2070_s16, %s2161_s19 }
   0xe   : > { %p43_p0 = scmp.ne.s32.totalorder %s2066_s15, %s2062_s14  ;;  %p34_p1 = scmp.eq.s32.totalorder %s33_s21, 0 }
   0xf   : > { %p44_p2 = scmp.eq.s32.totalorder %s2070_s16, 0  ;;  %p49_p3 = scmp.ne.s32.totalorder %s2062_s14, %s2058_s13 }
  0x10   : > { %p50_p4 = scmp.eq.s32.totalorder %s2157_s17, 0  ;;  %p272_p7 = scmp.eq.s32.totalorder %s2157_s17, 1 }
  0x11   : > { %s2173_s22 = scalar_select %p34_p1, %s2066_s15, %s36_s20  }
  0x12   : > { %p2175_p5 = por %p44_p2, %p43_p0  ;;  %p2179_p6 = por %p50_p4, %p49_p3 }
  0x13   : > { %2715 = sst [smem:[#allocation14_spill]] %s2173_s22  ;;  %p278_p8 = scmp.eq.s32.totalorder %s1742_s18, 1 }
  0x14   : > { %s2717_s24 = scalar_select %p2179_p6, 1, 0 }
  0x15   : > { %p1854_p10 = scmp.lt.s32.totalorder %s2070_s16, 2  ;;  %p2186_p11 = por %p272_p7, %p43_p0 }
  0x16   : > { %p2190_p12 = por %p278_p8, %p49_p3  ;;  %s2195_s27 = sand.u32 1, %s2066_s15  }
  0x17   : > { %s2718_s25 = scalar_select %p2186_p11, 1, 0 }
  0x18   : > { %s2719_s26 = scalar_select %p2190_p12, 1, 0 }
  0x19   : > { %s1772_s28 = sshll.u32 %s2070_s16, 10  ;;  %s1745_s29 = sshll.u32 %s2195_s27, 6 }
  0x1a   : > { %2720 = sst [smem:[#allocation15_spill]] %s2719_s26  ;;  %s323_s18 = scalar_lea.vmem [#allocation2], %s1745_s29 }
  0x1b   : > { %s2721_s0 = sld [smem:[#allocation16_spill]]  ;;  %s330_s20 = sshll.u32 %s323_s18, 4  ;;  %s2210_s20 = int_to_ptr.vmem [resolvable:$true] %s330_s20 }
  0x1c   : > { %p2206_p13 = pnand %p1854_p10, %p2175_p5 }
  0x1e   : > { %p1948_p1 = pneg %p2206_p13 }
  0x21   : > { %s2202_s12 = scalar_lea.hbm %s2721_s0, %s1772_s28  ;;  %s1951_s23 = scalar_lea.hbm %s2721_s0, 2048 }
  0x22   : > { %s1946_s15 = scalar_lea.hbm %s2202_s12, 1024  ;;  %p1952_p4 = scmp.lt.s32.totalorder %s2202_s12, %s2721_s0 }
  0x23   : > { %p1947_p0 = scmp.ne.s32.totalorder %s2202_s12, %s1946_s15  ;;  %p1953_p5 = scmp.lt.s32.totalorder %s1951_s23, %s1946_s15 }
  0x25   : > { %p1949_p2 = pnand %p1948_p1, %p1947_p0  ;;  %p1954_p7 = por %p1953_p5, %p1952_p4 }
  0x27   : > { %p1950_p3 = pneg %p1949_p2 }
  0x29   : > { %p1955_p8 = pnand %p1954_p7, %p1950_p3 }
  0x2b   : > { %1958 = shalt.err (!%p1955_p8)
}
  0x2c   : > { %s1959_s18 = scalar_lea.vmem %s2210_s20, 1024  ;;  %s2072_s28 = smov [#allocation2]  }
  0x2d   : > { %p1960_p10 = scmp.ne.s32.totalorder %s2210_s20, %s1959_s18  ;;  %s1964_s29 = sshll.u32 %s2072_s28, 4  ;;  %s1965_s29 = int_to_ptr.vmem [resolvable:$false] %s1964_s29 }
  0x2e   : > { %s1966_s22 = scalar_lea.vmem %s1965_s29, 2048  ;;  %p1967_p9 = scmp.lt.s32.totalorder %s2210_s20, %s1965_s29 }
  0x2f   : > { %p1962_p0 = pnand %p1960_p10, %p1948_p1  ;;  %p1968_p12 = scmp.lt.s32.totalorder %s1966_s22, %s1959_s18 }
  0x31   : > { %p1963_p2 = pneg %p1962_p0  ;;  %p1969_p11 = por %p1968_p12, %p1967_p9 }
  0x33   : > { %p1970_p4 = pnand %p1969_p11, %p1963_p2 }
  0x35   : > { %1973 = shalt.err (!%p1970_p4)
}
  0x36   : > { %s2073_s15 = smov 128   ;;  %s2074_s23 = smov 8  }
  0x37   : > { %s2723_s30 = scalar_lea.sflag [#allocation3], %s2195_s27  ;;  %p1750_p3 = scmp.ge.s32.totalorder %s2070_s16, 1 }
  0x38   : > { %1846 = dma.hbm_to_vmem [thread:$0]  (!%p2206_p13), %s2202_s12, 1024, %s2210_s20, %s2723_s30, %s2073_s15, %s2073_s15, %s2074_s23  }
  0x39   : > { %p363_p5 = scmp.lt.s32.totalorder %s2070_s16, 3  ;;  %s1748_s22 = sshll.u32 %s2195_s27, 3 }
  0x3a   : > { %s1749_s18 = sshll.u32 %s2070_s16, 7  ;;  %s351_s28 = scalar_lea.vmem [#allocation5], %s1748_s22 }
  0x3b   : > { %p2242_p9 = pnand %p1750_p3, %p363_p5  ;;  %s358_s29 = sshll.u32 %s351_s28, 4  ;;  %s359_s29 = int_to_ptr.vmem [resolvable:$true] %s358_s29 }
  0x3c   : > { %s356_s26 = scalar_lea.hbm %s2693_s2, %s1749_s18  ;;  %s348_s13 = scalar_lea.sflag [#allocation6], %s2195_s27 }
  0x3d   : > { %s2724_s11 = scalar_select %p2242_p9, 1, 0 }
  0x3e   : > { %s1974_s10 = scalar_lea.hbm %s356_s26, 128  ;;  %s1979_s15 = scalar_lea.hbm %s2693_s2, 256 }
  0x3f   : > { %p1975_p11 = scmp.ne.s32.totalorder %s356_s26, %s1974_s10  ;;  %p1980_p8 = scmp.lt.s32.totalorder %s356_s26, %s2693_s2 }
  0x40   : > { %p1981_p10 = scmp.lt.s32.totalorder %s1979_s15, %s1974_s10 }
  0x41   : > { %p1977_p12 = pnand %p1975_p11, %p1948_p1 }
  0x42   : > { %p1982_p0 = por %p1981_p10, %p1980_p8 }
  0x43   : > { %p1978_p7 = pneg %p1977_p12 }
  0x45   : > { %p1983_p2 = pnand %p1982_p0, %p1978_p7 }
  0x47   : > { %1986 = shalt.err (!%p1983_p2)
}
  0x48   : > { %s1987_s0 = scalar_lea.vmem %s359_s29, 128  ;;  %s2075_s19 = smov [#allocation5]  }
  0x49   : > { %p1988_p4 = scmp.ne.s32.totalorder %s359_s29, %s1987_s0  ;;  %s1992_s27 = sshll.u32 %s2075_s19, 4  ;;  %s1993_s27 = int_to_ptr.vmem [resolvable:$false] %s1992_s27 }
  0x4a   : > { %s1994_s22 = scalar_lea.vmem %s1993_s27, 256  ;;  %p1995_p11 = scmp.lt.s32.totalorder %s359_s29, %s1993_s27 }
  0x4b   : > { %p1990_p3 = pnand %p1988_p4, %p1948_p1  ;;  %p1996_p12 = scmp.lt.s32.totalorder %s1994_s22, %s1987_s0 }
  0x4d   : > { %p1991_p5 = pneg %p1990_p3  ;;  %p1997_p6 = por %p1996_p12, %p1995_p11 }
  0x4f   : > { %p1998_p9 = pnand %p1997_p6, %p1991_p5 }
  0x51   : > { %2001 = shalt.err (!%p1998_p9)
}
  0x52   : > { %1849 = dma.hbm_to_vmem [thread:$0]  (!%p2206_p13), %s356_s26, 128, %s359_s29, %s348_s13  }
  0x53   : > { %p2725_p7 = scmp.ne.s32.totalorder %s2724_s11, 0 }
  0x54   : > { %s2268_s10 = sand.u32 (!%p2725_p7), 1, %s2062_s14   ;;  %p2726_p1 = scmp.ne.s32.totalorder (!%p2725_p7), %s2717_s24, 0 }
  0x55   : > { %367 = sbr.rel (%p2725_p7) target bundleno = 1587 (0x633), region = 60  ;;  %s1751_s18 = sshll.u32 (!%p2725_p7), %s2268_s10, 6 }
  0x56   : > { %s370_s28 = scalar_lea.sflag (!%p2725_p7), [#allocation3], %s2268_s10  ;;  %s2272_s12 = scalar_lea.vmem (!%p2725_p7), [#allocation2], %s1751_s18 }
  0x5a   : > { %2045 = dma.done.wait (%p2726_p1), %s370_s28, 1024  }
  0x5b   : > { %2047 = vsyncadd (%p2726_p1), %s370_s28, 4294966272  ;;  %s1752_s13 = sshll.u32 %s2268_s10, 3  ;;  %s379_s26 = scalar_lea.sflag [#allocation6], %s2268_s10 }
  0x5c   : > { %s2282_s21 = scalar_lea.vmem [#allocation5], %s1752_s13 }
  0x5d   : > { %2049 = dma.done.wait (%p2726_p1), %s379_s26, 128  }
  0x5e   : > { %2051 = vsyncadd (%p2726_p1), %s379_s26, 4294967168  ;;  %p429_p6 = scmp.lt.s32.totalorder %s2157_s17, 1  ;;  %v486_v0 = vlaneseq  ;;  %v2076_v1 = vmov 0   ;;  %v2077_v2 = vmov 0.0   ;;  %vm2078_vm0 = vmmov 0   ;;  %v457_v5 = vld [vmem:[%s2698_s7] sm:$0xff] }
  0x5f   : > { %1894 = vset.pattern.permute.xlu0 %v2076_v1  ;;  %1815 = vmatprep.subr.mxu1 %v2077_v2  ;;  %v450_v10 = vld [vmem:[%s2695_s4 + $0x18] sm:$0xff]  ;;  %v449_v11 = vld [vmem:[%s2695_s4 + $0x10] sm:$0xff]  ;;  %v458_v12 = vld [vmem:[%s2699_s8] sm:$0xff]  ;;  %vm550_vm1 = vcmask 261120   ;;  %vm1148_vm2 = vcmask 1041409   ;;  %vm1150_vm3 = vcmask 1042434  }
  0x60   : > { %s430_s11 = scalar_select %p429_p6, %s2157_s17, 1  ;;  %v2292_v3 = vshrl.u32 %v486_v0, 7  ;;  %1895 = vset.pattern.permute.xlu1 %v2076_v1  ;;  %1823 = vmatprep.mubr.msk.f32.mxu1 %vm2078_vm0, %v2077_v2  ;;  %v446_v14 = vld [vmem:[%s2694_s3 + $0x18] sm:$0xff]  ;;  %v448_v15 = vld [vmem:[%s2695_s4 + $0x8] sm:$0xff]  ;;  %v445_v20 = vld [vmem:[%s2694_s3 + $0x10] sm:$0xff]  ;;  %vm1152_vm4 = vcmask 1043459  }
  0x61   : > { %462 = vperm.xlu0 %1894, %v457_v5   ;;  %1816 = vmatpush3.msra.mxu1 %v450_v10  ;;  %v447_v21 = vld [vmem:[%s2695_s4] sm:$0xff]  ;;  %v444_v23 = vld [vmem:[%s2694_s3 + $0x8] sm:$0xff]  ;;  %v435_v50 = vld [vmem:[%s2272_s12 + $0x10] sm:$0xff]  ;;  %vm1154_vm5 = vcmask 1044484   ;;  %vm1156_vm6 = vcmask 1045509   ;;  %vm1158_vm7 = vcmask 1046534  }
  0x62   : > { %s1754_s29 = sshll.u32 %s430_s11, 3  ;;  %v2300_v4 = vsub.s32 0, %v2292_v3  ;;  %v2310_v8 = vsub.s32 1, %v2292_v3  ;;  %v2313_v9 = vsub.s32 2, %v2292_v3  ;;  %1817 = vmatprep.subr.mxu1 %v2077_v2  ;;  %v2334_v17 = vsub.s32 3, %v2292_v3  ;;  %1795 = vmatprep.subr.mxu0 %v446_v14  ;;  %v442_v22 = vld [vmem:[%s2282_s21] sm:$0xff] }
  0x63   : > { %s432_s15 = scalar_lea.vmem %s2692_s1, %s1754_s29  ;;  %1818 = vmatpush3.msra.mxu1 %v449_v11  ;;  %v2338_v19 = vsub.s32 4, %v2292_v3  ;;  %1796 = vmatpush3.msra.mxu0 %v446_v14  ;;  %v2354_v25 = vsub.s32 5, %v2292_v3  ;;  %v2358_v27 = vsub.s32 6, %v2292_v3  ;;  %v443_v28 = vld [vmem:[%s2694_s3] sm:$0xff]  ;;  %v2367_v30 = vsub.s32 7, %v2292_v3  ;;  %v434_v49 = vld [vmem:[%s2272_s12 + $0x8] sm:$0xff] }
  0x64   : > { %v2305_v6 = vld [vmem:[%s432_s15] sm:$0xff]  ;;  %1819 = vmatprep.subr.mxu1 %v2077_v2  ;;  %1797 = vmatprep.subr.mxu0 %v445_v20  ;;  %v436_v53 = vld [vmem:[%s2272_s12 + $0x18] sm:$0xff]  ;;  %v438_v61 = vld [vmem:[%s2272_s12 + $0x28] sm:$0xff]  ;;  %vm1160_vm8 = vcmask 1047559   ;;  %vm1163_vm9 = vcmask 64512   ;;  %s1769_s0 = sshll.u32 %s2157_s17, 7 }
  0x65   : > { %v459_v7 = vmul.f32 %v2305_v6, %v2305_v6  ;;  %475 = vperm.xlu0 %1894, %v458_v12   ;;  %1820 = vmatpush3.msra.mxu1 %v448_v15  ;;  %v2375_v33 = vrot.slane %v2305_v6, %v2300_v4  ;;  %v2379_v34 = vrot.slane %v2305_v6, %v2310_v8  ;;  %v1766_v41 = vadd.f32 -1.0, %v2305_v6  ;;  %v433_v48 = vld [vmem:[%s2272_s12] sm:$0xff]  ;;  %v439_v12 = vld [vmem:[%s2272_s12 + $0x30] sm:$0xff]  ;;  %s427_s19 = scalar_lea.vmem [#allocation7], %s1752_s13  ;;  %s2727_s22 = sld [smem:[#allocation17_spill]] }
  0x66   : > { %1821 = vmatprep.subr.mxu1 %v2077_v2  ;;  %1798 = vmatpush3.msra.mxu0 %v445_v20  ;;  %v2384_v35 = vrot.slane %v2305_v6, %v2313_v9  ;;  %v2389_v36 = vrot.slane %v2305_v6, %v2334_v17  ;;  %v2394_v37 = vrot.slane %v2305_v6, %v2338_v19  ;;  %v437_v59 = vld [vmem:[%s2272_s12 + $0x20] sm:$0xff]  ;;  %v440_v20 = vld [vmem:[%s2272_s12 + $0x38] sm:$0xff]  ;;  %s1637_s21 = sshll.u32 %s427_s19, 4  ;;  %vm1621_vm10 = vcmask 130048   ;;  %s1624_s28 = scalar_lea.sflag [#allocation4], %s2268_s10  ;;  %s2650_s21 = int_to_ptr.vmem [resolvable:$true] %s1637_s21 }
  0x67   : > { %v489_v13 = vrot.slane %v459_v7, %v2300_v4  ;;  %v496_v16 = vrot.slane %v459_v7, %v2310_v8  ;;  %v503_v18 = vrot.slane %v459_v7, %v2313_v9  ;;  %v510_v24 = vrot.slane %v459_v7, %v2334_v17  ;;  %1822 = vmatpush3.msra.mxu1 %v447_v21  ;;  %s2002_s26 = scalar_lea.vmem %s2650_s21, 128  ;;  %p2728_p9 = scmp.ne.s32.totalorder %s2718_s25, 0 }
  0x68   : > { %v517_v26 = vrot.slane %v459_v7, %v2338_v19  ;;  %1824 = vmatmul.mubr.msk.f32.vlgmr.msra.gmra.mxu1 %vm550_vm1, %v442_v22  ;;  %1799 = vmatprep.subr.mxu0 %v444_v23  ;;  %v524_v29 = vrot.slane %v459_v7, %v2354_v25  ;;  %v531_v31 = vrot.slane %v459_v7, %v2358_v27  ;;  %v2414_v42 = vmul.f32 2e+32, %v1766_v41  ;;  %p2003_p13 = scmp.ne.s32.totalorder %s2650_s21, %s2002_s26  ;;  %s2080_s17 = smov [#allocation7]  }
  0x69   : > { %491 = vbcast.lane.b32.xlu1 %v489_v13, 256  ;;  %505 = vbcast.lane.b32.xlu0 %v503_v18, 256  ;;  %v538_v32 = vrot.slane %v459_v7, %v2367_v30  ;;  %v2399_v38 = vrot.slane %v2305_v6, %v2354_v25  ;;  %v2404_v39 = vrot.slane %v2305_v6, %v2358_v27  ;;  %s2006_s13 = sshll.u32 %s2080_s17, 4  ;;  %s2007_s13 = int_to_ptr.vmem [resolvable:$false] %s2006_s13 }
  0x6a   : > { %1800 = vmatpush3.msra.mxu0 %v444_v23  ;;  %1826 = vmatprep.subr.mxu1 %v2077_v2  ;;  %v2409_v40 = vrot.slane %v2305_v6, %v2367_v30  ;;  %v1013_v43 = vrot.slane %v2414_v42, %v2300_v4  ;;  %v1027_v44 = vrot.slane %v2414_v42, %v2313_v9  ;;  %p2004_p8 = pnand %p2003_p13, %p2728_p9  ;;  %s2008_s11 = scalar_lea.vmem %s2007_s13, 256 }
  0x6b   : > { %1801 = vmatprep.subr.mxu0 %v443_v28  ;;  %1834 = vmatprep.mubr.msk.f32.mxu1 %vm2078_vm0, %v2077_v2  ;;  %s2648_s18 = scalar_lea.hbm %s2727_s22, %s1769_s0  ;;  %p2009_p0 = scmp.lt.s32.totalorder %s2650_s21, %s2007_s13 }
  0x6c   : > { %1802 = vmatpush3.msra.mxu0 %v443_v28  ;;  %p2005_p10 = pneg %p2004_p8  ;;  %p2010_p2 = scmp.lt.s32.totalorder %s2008_s11, %s2002_s26 }
  0x6d   : > { %498 = vbcast.lane.b32.xlu1 %v496_v16, 256  ;;  %519 = vbcast.lane.b32.xlu0 %v517_v26, 256 }
  0x6e   : > { %p2011_p4 = por %p2010_p2, %p2009_p0 }
  0x70   : > { %p2012_p3 = pnand %p2011_p4, %p2005_p10 }
  0x71   : > { %512 = vbcast.lane.b32.xlu1 %v510_v24, 256  ;;  %533 = vbcast.lane.b32.xlu0 %v531_v31, 256 }
  0x75   : > { %526 = vbcast.lane.b32.xlu1 %v524_v29, 256  ;;  %685 = vbcast.lane.b32.xlu0 %v2375_v33, 256 }
  0x79   : > { %540 = vbcast.lane.b32.xlu1 %v538_v32, 256  ;;  %699 = vbcast.lane.b32.xlu0 %v2384_v35, 256 }
  0x7d   : > { %692 = vbcast.lane.b32.xlu1 %v2379_v34, 256  ;;  %713 = vbcast.lane.b32.xlu0 %v2394_v37, 256 }
  0x81   : > { %706 = vbcast.lane.b32.xlu1 %v2389_v36, 256  ;;  %727 = vbcast.lane.b32.xlu0 %v2404_v39, 256 }
  0x85   : > { %720 = vbcast.lane.b32.xlu1 %v2399_v38, 256 }
  0x89   : > { %734 = vbcast.lane.b32.xlu1 %v2409_v40, 256 }
  0x8d   : > { %1015 = vbcast.lane.b32.xlu1 %v1013_v43, 256  ;;  %v1034_v43 = vrot.slane %v2414_v42, %v2334_v17 }
  0x91   : > { %1029 = vbcast.lane.b32.xlu1 %v1027_v44, 256 }
  0x95   : > { %1036 = vbcast.lane.b32.xlu1 %v1034_v43, 256 }
  0xdb   : > { %v492_v45 = vpop.permute.xlu1 %491 }
  0xdc   : > { %v463_v47 = vpop.permute.xlu0 %462 }
  0xdd   : > { %v465_v51 = vmul.f32 %v463_v47, %v433_v48  ;;  %v466_v52 = vmul.f32 %v463_v47, %v434_v49  ;;  %v467_v56 = vmul.f32 %v463_v47, %v435_v50  ;;  %v468_v60 = vmul.f32 %v463_v47, %v436_v53 }
  0xde   : > { %v469_v10 = vmul.f32 %v463_v47, %v437_v59  ;;  %v470_v11 = vmul.f32 %v463_v47, %v438_v61  ;;  %v471_v22 = vmul.f32 %v463_v47, %v439_v12  ;;  %v472_v26 = vmul.f32 %v463_v47, %v440_v20 }
  0xdf   : > { %v499_v46 = vpop.permute.xlu1 %498  ;;  %v1020_v47 = vrot.slane %v2414_v42, %v2310_v8  ;;  %v1041_v48 = vrot.slane %v2414_v42, %v2338_v19  ;;  %v2079_v49 = vmov 1966171168  }
  0xe0   : > { %v476_v54 = vpop.permute.xlu0 %475  ;;  %v826_v50 = vunpack.c.l.s4 %v2079_v49 }
  0xe1   : > { %v478_v57 = vadd.f32 %v476_v54, %v465_v51  ;;  %v479_v58 = vadd.f32 %v476_v54, %v466_v52  ;;  %v480_v62 = vadd.f32 %v476_v54, %v467_v56  ;;  %v481_v6 = vadd.f32 %v476_v54, %v468_v60  ;;  %1022 = vbcast.lane.b32.xlu0 %v1020_v47, 256  ;;  %v1763_v52 = vld [vmem:[%s2696_s5] ss:$0 sm:$0xff] }
  0xe2   : > { %v482_v14 = vadd.f32 %v476_v54, %v469_v10  ;;  %v483_v15 = vadd.f32 %v476_v54, %v470_v11  ;;  %v484_v23 = vadd.f32 %v476_v54, %v471_v22  ;;  %v485_v32 = vadd.f32 %v476_v54, %v472_v26 }
  0xe3   : > { %v513_v55 = vpop.permute.xlu1 %512  ;;  %v2426_v63 = vmul.f32 %v492_v45, %v478_v57  ;;  %v2428_v1 = vmul.f32 %v499_v46, %v479_v58  ;;  %v1048_v45 = vrot.slane %v2414_v42, %v2354_v25  ;;  %v827_v51 = vunpack.c.0.s8 %v826_v50 }
  0xe4   : > { %v506_v5 = vpop.permute.xlu0 %505  ;;  %v2439_v18 = vmul.f32 %v513_v55, %v481_v6 }
  0xe5   : > { %v2430_v7 = vmul.f32 %v506_v5, %v480_v62  ;;  %1803 = vmatprep.mubr.msk.f32.mxu0 %vm550_vm1, %v2426_v63  ;;  %1050 = vbcast.lane.b32.xlu1 %v1048_v45, 256  ;;  %v830_v54 = vsub.s32 %v827_v51, %v2292_v3 }
  0xe6   : > { %1804 = vmatmul.mubr.msk.f32.vlgmr.msra.gmra.mxu0 %vm550_vm1, %v2428_v1  ;;  %1043 = vbcast.lane.b32.xlu0 %v1041_v48, 256 }
  0xe7   : > { %v527_v13 = vpop.permute.xlu1 %526  ;;  %1806 = vmatprep.mubr.msk.f32.mxu0 %vm550_vm1, %v2430_v7 }
  0xe8   : > { %v520_v16 = vpop.permute.xlu0 %519  ;;  %v2448_v24 = vmul.f32 %v527_v13, %v483_v15 }
  0xe9   : > { %v2442_v21 = vmul.f32 %v520_v16, %v482_v14 }
  0xea   : > { %1807 = vmatmul.mubr.msk.f32.gmra.mxu0 %vm550_vm1, %v2439_v18 }
  0xeb   : > { %1809 = vmatprep.mubr.msk.f32.mxu0 %vm550_vm1, %v2442_v21  ;;  %v541_v29 = vpop.permute.xlu1 %540 }
  0xec   : > { %v534_v28 = vpop.permute.xlu0 %533  ;;  %v2456_v41 = vmul.f32 %v541_v29, %v485_v32 }
  0xed   : > { %v2450_v31 = vmul.f32 %v534_v28, %v484_v23 }
  0xee   : > { %1810 = vmatmul.mubr.msk.f32.gmra.mxu0 %vm550_vm1, %v2448_v24 }
  0xef   : > { %1812 = vmatprep.mubr.msk.f32.mxu0 %vm550_vm1, %v2450_v31  ;;  %v693_v58 = vpop.permute.xlu1 %692 }
  0xf0   : > { %v686_v59 = vpop.permute.xlu0 %685 }
  0xf2   : > { %1813 = vmatmul.mubr.msk.f32.gmra.mxu0 %vm550_vm1, %v2456_v41 }
  0xf3   : > { %v707_v5 = vpop.permute.xlu1 %706 }
  0xf4   : > { %v700_v13 = vpop.permute.xlu0 %699 }
  0xf7   : > { %v721_v29 = vpop.permute.xlu1 %720 }
  0xf8   : > { %v714_v48 = vpop.permute.xlu0 %713 }
 0x128   : > { %v819_v44 = vpop.f32.mrf.mxu1 }
 0x129   : > { %v820_v53 = vadd.f32 %v1763_v52, %v819_v44 }
 0x12a   : > { %v1825_v46 = vpop.f32.mrf.mxu1 }
 0x12b   : > { %v831_v55 = vrot.slane %v820_v53, %v830_v54  ;;  %v824_v57 = vcombine.high %v820_v53, %v820_v53 }
 0x12d   : > { %v839_v56 = vcombine.high %v831_v55, %v831_v55  ;;  %v838_v61 = vrot.slane %v824_v57, %v830_v54  ;;  %v847_v62 = vrot.slane %v831_v55, %v830_v54 }
 0x12f   : > { %v861_v60 = vrot.slane %v839_v56, %v830_v54  ;;  %v840_v11 = vcombine.high %v838_v61, %v838_v61  ;;  %v876_v15 = vrot.slane %v847_v62, %v2300_v4  ;;  %v869_v20 = vcombine.high %v847_v62, %v847_v62 }
 0x130   : > { %v854_v49 = vrot.slane %v838_v61, %v830_v54 }
 0x131   : > { %v880_v6 = vrot.slane %v861_v60, %v2300_v4  ;;  %v871_v10 = vcombine.high %v861_v60, %v861_v60  ;;  %v868_v32 = vrot.slane %v840_v11, %v830_v54  ;;  %v884_v47 = vrot.slane %v869_v20, %v2300_v4 }
 0x132   : > { %v870_v11 = vcombine.high %v854_v49, %v854_v49 }
 0x133   : > { %v888_v26 = vrot.slane %v871_v10, %v2300_v4  ;;  %v872_v56 = vcombine.high %v868_v32, %v868_v32  ;;  %v896_v62 = vrot.slane %v868_v32, %v2300_v4  ;;  %v735_v10 = vpop.permute.xlu1 %734 }
 0x1a6   : > { %v1805_v12 = vpop.f32.mrf.mxu0 }
 0x1a7   : > { %v737_v14 = vmul.f32 %v1805_v12, %v693_v58 }
 0x1a8   : > { %v641_v16 = vpop.f32.mrf.mxu0 }
 0x1a9   : > { %v914_v22 = vadd.f32 %v880_v6, %v737_v14  ;;  %v736_v23 = vmul.f32 %v686_v59, %v641_v16  ;;  %v728_v16 = vpop.permute.xlu0 %727 }
 0x1aa   : > { %v1808_v28 = vpop.f32.mrf.mxu0 }
 0x1ab   : > { %v922_v43 = vsub.f32 0.0, %v914_v22  ;;  %v913_v44 = vadd.f32 %v876_v15, %v736_v23  ;;  %v739_v45 = vmul.f32 %v1808_v28, %v707_v5  ;;  %v892_v5 = vrot.slane %v854_v49, %v2300_v4 }
 0x1ac   : > { %v651_v46 = vpop.f32.mrf.mxu0  ;;  %v904_v15 = vrot.slane %v872_v56, %v2300_v4 }
 0x1ad   : > { %v931_v50 = vmul.f32 1.442695, %v922_v43  ;;  %v921_v51 = vsub.f32 0.0, %v913_v44  ;;  %v916_v52 = vadd.f32 %v888_v26, %v739_v45  ;;  %v738_v53 = vmul.f32 %v700_v13, %v651_v46 }
 0x1ae   : > { %v1811_v55 = vpop.f32.mrf.mxu0 }
 0x1af   : > { %1896 = vpow2.f32 %v931_v50  ;;  %v929_v57 = vmul.f32 1.442695, %v921_v51  ;;  %v924_v58 = vsub.f32 0.0, %v916_v52  ;;  %v915_v59 = vadd.f32 %v884_v47, %v738_v53 }
 0x1b0   : > { %v741_v60 = vmul.f32 %v1811_v55, %v721_v29  ;;  %v661_v6 = vpop.f32.mrf.mxu0  ;;  %v900_v29 = vrot.slane %v870_v11, %v2300_v4 }
 0x1b1   : > { %1898 = vpow2.f32 %v929_v57  ;;  %v935_v54 = vmul.f32 1.442695, %v924_v58  ;;  %v923_v61 = vsub.f32 0.0, %v915_v59  ;;  %v740_v12 = vmul.f32 %v714_v48, %v661_v6 }
 0x1b2   : > { %v918_v14 = vadd.f32 %v896_v62, %v741_v60  ;;  %v1814_v13 = vpop.f32.mrf.mxu0 }
 0x1b3   : > { %1900 = vpow2.f32 %v935_v54  ;;  %v933_v20 = vmul.f32 1.442695, %v923_v61  ;;  %v917_v22 = vadd.f32 %v892_v5, %v740_v12  ;;  %v743_v23 = vmul.f32 %v1814_v13, %v735_v10  ;;  %v1765_v12 = vld [vmem:[%s2697_s6] ss:$0 sm:$0xff] }
 0x1b4   : > { %v926_v26 = vsub.f32 0.0, %v918_v14  ;;  %v671_v28 = vpop.f32.mrf.mxu0 }
 0x1b5   : > { %1902 = vpow2.f32 %v933_v20  ;;  %v925_v32 = vsub.f32 0.0, %v917_v22  ;;  %v920_v43 = vadd.f32 %v904_v15, %v743_v23  ;;  %v742_v44 = vmul.f32 %v728_v16, %v671_v28 }
 0x1b6   : > { %v939_v45 = vmul.f32 1.442695, %v926_v26 }
 0x1b7   : > { %v937_v46 = vmul.f32 1.442695, %v925_v32  ;;  %v928_v47 = vsub.f32 0.0, %v920_v43  ;;  %v919_v48 = vadd.f32 %v900_v29, %v742_v44 }
 0x1b8   : > { %1904 = vpow2.f32 %v939_v45 }
 0x1b9   : > { %1906 = vpow2.f32 %v937_v46  ;;  %v943_v49 = vmul.f32 1.442695, %v928_v47  ;;  %v927_v50 = vsub.f32 0.0, %v919_v48 }
 0x1bb   : > { %1908 = vpow2.f32 %v943_v49  ;;  %v941_v51 = vmul.f32 1.442695, %v927_v50 }
 0x1bc   : > { %v1897_v52 = vpop.eup %1896 }
 0x1bd   : > { %v946_v53 = vadd.f32 1.0, %v1897_v52  ;;  %1910 = vpow2.f32 %v941_v51 }
 0x1be   : > { %v1899_v55 = vpop.eup %1898 }
 0x1bf   : > { %1912 = vrcp.f32 %v946_v53  ;;  %v945_v56 = vadd.f32 1.0, %v1899_v55 }
 0x1c0   : > { %v1901_v57 = vpop.eup %1900 }
 0x1c1   : > { %1914 = vrcp.f32 %v945_v56  ;;  %v948_v58 = vadd.f32 1.0, %v1901_v57 }
 0x1c2   : > { %v1903_v59 = vpop.eup %1902 }
 0x1c3   : > { %1916 = vrcp.f32 %v948_v58  ;;  %v947_v60 = vadd.f32 1.0, %v1903_v59  ;;  %v1062_v58 = vrot.slane %v2414_v42, %v2367_v30  ;;  %v1055_v59 = vrot.slane %v2414_v42, %v2358_v27 }
 0x1c5   : > { %v1905_v62 = vpop.eup %1904  ;;  %1918 = vrcp.f32 %v947_v60  ;;  %v1016_v60 = vpop.permute.xlu1 %1015 }
 0x1c6   : > { %v1907_v6 = vpop.eup %1906  ;;  %v950_v5 = vadd.f32 1.0, %v1905_v62 }
 0x1c7   : > { %v949_v10 = vadd.f32 1.0, %v1907_v6 }
 0x1c8   : > { %v1909_v11 = vpop.eup %1908  ;;  %1920 = vrcp.f32 %v950_v5  ;;  %v1023_v5 = vpop.permute.xlu0 %1022 }
 0x1c9   : > { %1922 = vrcp.f32 %v949_v10  ;;  %v952_v54 = vadd.f32 1.0, %v1909_v11  ;;  %v1030_v62 = vpop.permute.xlu1 %1029 }
 0x1ca   : > { %v1911_v61 = vpop.eup %1910 }
 0x1cb   : > { %v951_v14 = vadd.f32 1.0, %v1911_v61  ;;  %1924 = vrcp.f32 %v952_v54 }
 0x1cc   : > { %v1913_v13 = vpop.eup %1912  ;;  %v1044_v11 = vpop.permute.xlu0 %1043 }
 0x1cd   : > { %1926 = vrcp.f32 %v951_v14  ;;  %v976_v15 = vmul.f32 %v1913_v13, %v1765_v12  ;;  %v1037_v6 = vpop.permute.xlu1 %1036 }
 0x1ce   : > { %v1915_v16 = vpop.eup %1914 }
 0x1cf   : > { %v986_v20 = vsel %vm550_vm1, %v976_v15, 0.0  ;;  %v975_v22 = vmul.f32 %v1915_v16, %v1765_v12 }
 0x1d0   : > { %v1917_v23 = vpop.eup %1916  ;;  %987 = vadd.xlane.f32.xlu1 %v986_v20 }
 0x1d1   : > { %v983_v26 = vsel %vm550_vm1, %v975_v22, 0.0  ;;  %v978_v28 = vmul.f32 %v1917_v23, %v1765_v12  ;;  %v1051_v10 = vpop.permute.xlu1 %1050 }
 0x1d2   : > { %v1919_v29 = vpop.eup %1918  ;;  %984 = vadd.xlane.f32.xlu0 %v983_v26 }
 0x1d3   : > { %v992_v43 = vsel %vm550_vm1, %v978_v28, 0.0  ;;  %v977_v44 = vmul.f32 %v1919_v29, %v1765_v12 }
 0x1d5   : > { %v1921_v32 = vpop.eup %1920  ;;  %v989_v48 = vsel %vm550_vm1, %v977_v44, 0.0 }
 0x1d6   : > { %v1923_v45 = vpop.eup %1922  ;;  %993 = vadd.xlane.f32.xlu0 %v992_v43  ;;  %v980_v50 = vmul.f32 %v1921_v32, %v1765_v12 }
 0x1d7   : > { %v979_v46 = vmul.f32 %v1923_v45, %v1765_v12 }
 0x1d8   : > { %v1925_v47 = vpop.eup %1924  ;;  %v998_v53 = vsel %vm550_vm1, %v980_v50, 0.0 }
 0x1d9   : > { %v995_v49 = vsel %vm550_vm1, %v979_v46, 0.0  ;;  %v982_v56 = vmul.f32 %v1925_v47, %v1765_v12  ;;  %v1115_v46 = vand.u32 127, %v486_v0 }
 0x1da   : > { %v1927_v51 = vpop.eup %1926  ;;  %990 = vadd.xlane.f32.xlu0 %v989_v48  ;;  %996 = vadd.xlane.f32.xlu1 %v995_v49 }
 0x1db   : > { %v981_v52 = vmul.f32 %v1927_v51, %v1765_v12  ;;  %v1004_v57 = vsel %vm550_vm1, %v982_v56, 0.0  ;;  %v2512_v49 = vsub.s32 %v1115_v46, %v2292_v3 }
 0x1dd   : > { %v1001_v55 = vsel %vm550_vm1, %v981_v52, 0.0 }
 0x1de   : > { %999 = vadd.xlane.f32.xlu0 %v998_v53  ;;  %1002 = vadd.xlane.f32.xlu1 %v1001_v55 }
 0x1e2   : > { %1005 = vadd.xlane.f32.xlu0 %v1004_v57 }
 0x1ef   : > { %1064 = vbcast.lane.b32.xlu1 %v1062_v58, 256 }
 0x1f8   : > { %1057 = vbcast.lane.b32.xlu0 %v1055_v59, 256 }
 0x259   : > { %v988_v54 = vpop.xlane.xlu1 %987 }
 0x25a   : > { %v2495_v61 = vadd.f32 %v1023_v5, %v988_v54 }
 0x25b   : > { %v985_v12 = vpop.xlane.xlu0 %984 }
 0x25c   : > { %v1074_v14 = vadd.f32 %v1016_v60, %v985_v12  ;;  %1094 = vperm.xlu1 %1895, %v2495_v61  }
 0x25e   : > { %1091 = vperm.xlu0 %1894, %v1074_v14  }
 0x25f   : > { %v994_v13 = vpop.xlane.xlu0 %993 }
 0x260   : > { %v2498_v15 = vadd.f32 %v1037_v6, %v994_v13 }
 0x262   : > { %1100 = vperm.xlu1 %1895, %v2498_v15  }
 0x263   : > { %v991_v42 = vpop.xlane.xlu0 %990  ;;  %v997_v16 = vpop.xlane.xlu1 %996 }
 0x264   : > { %v1076_v20 = vadd.f32 %v1030_v62, %v991_v42  ;;  %v1078_v26 = vadd.f32 %v1044_v11, %v997_v16 }
 0x266   : > { %1097 = vperm.xlu0 %1894, %v1076_v20  }
 0x267   : > { %v1000_v22 = vpop.xlane.xlu0 %999  ;;  %v1003_v23 = vpop.xlane.xlu1 %1002 }
 0x268   : > { %v2501_v28 = vadd.f32 %v1051_v10, %v1000_v22 }
 0x26a   : > { %1103 = vperm.xlu0 %1894, %v1078_v26   ;;  %1106 = vperm.xlu1 %1895, %v2501_v28  }
 0x26b   : > { %v1006_v29 = vpop.xlane.xlu0 %1005  ;;  %v1065_v32 = vpop.permute.xlu1 %1064 }
 0x26c   : > { %v2504_v43 = vadd.f32 %v1065_v32, %v1006_v29 }
 0x26e   : > { %1112 = vperm.xlu1 %1895, %v2504_v43  }
 0x26f   : > { %v1058_v44 = vpop.permute.xlu0 %1057 }
 0x270   : > { %v2507_v45 = vadd.f32 %v1058_v44, %v1003_v23 }
 0x272   : > { %1109 = vperm.xlu0 %1894, %v2507_v45  }
 0x2d7   : > { %v1095_v48 = vpop.permute.xlu1 %1094 }
 0x2d8   : > { %v1123_v55 = vrot.slane %v1095_v48, %v2512_v49 }
 0x2d9   : > { %v1092_v47 = vpop.permute.xlu0 %1091 }
 0x2da   : > { %v1119_v52 = vrot.slane %v1092_v47, %v2512_v49 }
 0x2dc   : > { %v1149_v58 = vsel %vm1148_vm2, %v1123_v55, %v1119_v52 }
 0x2dd   : > { %v1101_v51 = vpop.permute.xlu1 %1100 }
 0x2de   : > { %v1131_v59 = vrot.slane %v1101_v51, %v2512_v49 }
 0x2e1   : > { %v1098_v50 = vpop.permute.xlu0 %1097 }
 0x2e2   : > { %v1127_v53 = vrot.slane %v1098_v50, %v2512_v49 }
 0x2e4   : > { %v1151_v0 = vsel %vm1150_vm3, %v1127_v53, %v1149_v58 }
 0x2e5   : > { %v1104_v56 = vpop.permute.xlu0 %1103  ;;  %v1107_v57 = vpop.permute.xlu1 %1106  ;;  %v1153_v60 = vsel %vm1152_vm4, %v1131_v59, %v1151_v0 }
 0x2e6   : > { %v1135_v3 = vrot.slane %v1104_v56, %v2512_v49  ;;  %v1139_v62 = vrot.slane %v1107_v57, %v2512_v49 }
 0x2e8   : > { %v1155_v6 = vsel %vm1154_vm5, %v1135_v3, %v1153_v60 }
 0x2e9   : > { %v1113_v5 = vpop.permute.xlu1 %1112  ;;  %v1157_v54 = vsel %vm1156_vm6, %v1139_v62, %v1155_v6 }
 0x2ea   : > { %v1147_v12 = vrot.slane %v1113_v5, %v2512_v49 }
 0x2ed   : > { %v1110_v10 = vpop.permute.xlu0 %1109 }
 0x2ee   : > { %v1143_v11 = vrot.slane %v1110_v10, %v2512_v49 }
 0x2f0   : > { %v1159_v13 = vsel %vm1158_vm7, %v1143_v11, %v1157_v54 }
 0x2f1   : > { %v1161_v42 = vsel %vm1160_vm8, %v1147_v12, %v1159_v13 }
 0x2f2   : > { %v1164_v16 = vsel %vm1163_vm9, %v1161_v42, -inf }
 0x2f3   : > { %1165 = vmax.xlane.f32.xlu0 %v1164_v16 }
 0x37c   : > { %v1166_v22 = vpop.xlane.xlu0 %1165 }
 0x37d   : > { %v1171_v23 = vrot.slane %v1166_v22, %v2300_v4  ;;  %v1175_v29 = vrot.slane %v1166_v22, %v2310_v8  ;;  %v1179_v32 = vrot.slane %v1166_v22, %v2313_v9  ;;  %v1183_v48 = vrot.slane %v1166_v22, %v2334_v17 }
 0x37e   : > { %v1187_v52 = vrot.slane %v1166_v22, %v2338_v19  ;;  %v1191_v56 = vrot.slane %v1166_v22, %v2354_v25  ;;  %v1199_v3 = vrot.slane %v1166_v22, %v2367_v30 }
 0x37f   : > { %v1208_v44 = vsub.f32 %v1074_v14, %v1171_v23  ;;  %v1209_v46 = vsub.f32 %v2495_v61, %v1175_v29  ;;  %v1210_v50 = vsub.f32 %v1076_v20, %v1179_v32  ;;  %v1211_v53 = vsub.f32 %v2498_v15, %v1183_v48 }
 0x380   : > { %v1212_v57 = vsub.f32 %v1078_v26, %v1187_v52  ;;  %v1195_v14 = vrot.slane %v1166_v22, %v2358_v27  ;;  %v1213_v61 = vsub.f32 %v2501_v28, %v1191_v56  ;;  %v1215_v26 = vsub.f32 %v2504_v43, %v1199_v3 }
 0x381   : > { %v1216_v47 = vmul.f32 1.442695, %v1208_v44  ;;  %v1218_v51 = vmul.f32 1.442695, %v1209_v46  ;;  %v1220_v55 = vmul.f32 1.442695, %v1210_v50 }
 0x382   : > { %v1222_v58 = vmul.f32 1.442695, %v1211_v53  ;;  %v1224_v0 = vmul.f32 1.442695, %v1212_v57  ;;  %v1214_v15 = vsub.f32 %v2507_v45, %v1195_v14  ;;  %v1226_v59 = vmul.f32 1.442695, %v1213_v61 }
 0x383   : > { %1928 = vpow2.f32 %v1216_v47  ;;  %v1230_v6 = vmul.f32 1.442695, %v1215_v26 }
 0x384   : > { %1930 = vpow2.f32 %v1218_v51  ;;  %v1228_v28 = vmul.f32 1.442695, %v1214_v15 }
 0x385   : > { %1932 = vpow2.f32 %v1220_v55 }
 0x386   : > { %1934 = vpow2.f32 %v1222_v58 }
 0x387   : > { %1936 = vpow2.f32 %v1224_v0 }
 0x388   : > { %1938 = vpow2.f32 %v1226_v59 }
 0x389   : > { %1940 = vpow2.f32 %v1228_v28 }
 0x38a   : > { %1942 = vpow2.f32 %v1230_v6 }
 0x390   : > { %v2540_v20 = vpop.eup %1928 }
 0x391   : > { %1241 = vperm.xlu1 %1895, %v2540_v20   ;;  %v2545_v60 = vpop.eup %1930 }
 0x392   : > { %v2549_v62 = vpop.eup %1932 }
 0x393   : > { %v1935_v5 = vpop.eup %1934 }
 0x394   : > { %v2552_v45 = vpop.eup %1936 }
 0x395   : > { %1244 = vperm.xlu1 %1895, %v2545_v60   ;;  %v2555_v10 = vpop.eup %1938 }
 0x396   : > { %v2558_v43 = vpop.eup %1940 }
 0x397   : > { %v2561_v11 = vpop.eup %1942 }
 0x399   : > { %1247 = vperm.xlu1 %1895, %v2549_v62  }
 0x39d   : > { %1250 = vperm.xlu1 %1895, %v1935_v5  }
 0x3a1   : > { %1253 = vperm.xlu1 %1895, %v2552_v45  }
 0x3a5   : > { %1256 = vperm.xlu1 %1895, %v2555_v10  }
 0x3a9   : > { %1259 = vperm.xlu1 %1895, %v2558_v43  }
 0x3ad   : > { %1262 = vperm.xlu1 %1895, %v2561_v11  }
 0x3b1   : > { %1363 = vbcast.lane.b32.xlu1 %v2375_v33, 256 }
 0x3b5   : > { %1377 = vbcast.lane.b32.xlu1 %v2384_v35, 256 }
 0x3b9   : > { %1384 = vbcast.lane.b32.xlu1 %v2389_v36, 256 }
 0x3bd   : > { %1391 = vbcast.lane.b32.xlu1 %v2394_v37, 256 }
 0x3c1   : > { %1398 = vbcast.lane.b32.xlu1 %v2399_v38, 256 }
 0x3c5   : > { %1405 = vbcast.lane.b32.xlu1 %v2404_v39, 256 }
 0x3c9   : > { %1412 = vbcast.lane.b32.xlu1 %v2409_v40, 256 }
 0x40c   : > { %v1242_v54 = vpop.permute.xlu1 %1241 }
 0x40d   : > { %v1267_v36 = vrot.slane %v1242_v54, %v2512_v49 }
 0x410   : > { %v1245_v12 = vpop.permute.xlu1 %1244 }
 0x411   : > { %v1271_v33 = vrot.slane %v1245_v12, %v2512_v49 }
 0x413   : > { %v1296_v39 = vsel %vm1148_vm2, %v1271_v33, %v1267_v36 }
 0x414   : > { %v1248_v13 = vpop.permute.xlu1 %1247 }
 0x415   : > { %v1275_v35 = vrot.slane %v1248_v13, %v2512_v49 }
 0x417   : > { %v1297_v29 = vsel %vm1150_vm3, %v1275_v35, %v1296_v39 }
 0x418   : > { %v1251_v42 = vpop.permute.xlu1 %1250 }
 0x419   : > { %v1279_v37 = vrot.slane %v1251_v42, %v2512_v49 }
 0x41b   : > { %v1298_v44 = vsel %vm1152_vm4, %v1279_v37, %v1297_v29 }
 0x41c   : > { %v1254_v16 = vpop.permute.xlu1 %1253 }
 0x41d   : > { %v1283_v38 = vrot.slane %v1254_v16, %v2512_v49 }
 0x41f   : > { %v1299_v46 = vsel %vm1154_vm5, %v1283_v38, %v1298_v44 }
 0x420   : > { %v1257_v22 = vpop.permute.xlu1 %1256 }
 0x421   : > { %v1287_v40 = vrot.slane %v1257_v22, %v2512_v49 }
 0x423   : > { %v1300_v48 = vsel %vm1156_vm6, %v1287_v40, %v1299_v46 }
 0x424   : > { %v1260_v23 = vpop.permute.xlu1 %1259 }
 0x425   : > { %v1291_v32 = vrot.slane %v1260_v23, %v2512_v49 }
 0x427   : > { %v1301_v51 = vsel %vm1158_vm7, %v1291_v32, %v1300_v48 }
 0x428   : > { %v1263_v47 = vpop.permute.xlu1 %1262 }
 0x429   : > { %v1295_v50 = vrot.slane %v1263_v47, %v2512_v49 }
 0x42b   : > { %v1302_v52 = vsel %vm1160_vm8, %v1295_v50, %v1301_v51 }
 0x42c   : > { %v1304_v53 = vsel %vm1163_vm9, %v1302_v52, 0.0  ;;  %v1364_v55 = vpop.permute.xlu1 %1363 }
 0x42d   : > { %1305 = vadd.xlane.f32.xlu0 %v1304_v53 }
 0x430   : > { %v1378_v56 = vpop.permute.xlu1 %1377 }
 0x434   : > { %v1385_v58 = vpop.permute.xlu1 %1384 }
 0x438   : > { %v1392_v14 = vpop.permute.xlu1 %1391 }
 0x43c   : > { %v1399_v59 = vpop.permute.xlu1 %1398 }
 0x443   : > { %1370 = vbcast.lane.b32.xlu0 %v2379_v34, 256 }
 0x4b6   : > { %v1306_v57 = vpop.xlane.xlu0 %1305 }
 0x4b7   : > { %1944 = vrcp.f32 %v1306_v57 }
 0x4ba   : > { %v1371_v26 = vpop.permute.xlu0 %1370 }
 0x4c4   : > { %v1945_v61 = vpop.eup %1944 }
 0x4c5   : > { %v1324_v0 = vrot.slane %v1945_v61, %v2334_v17  ;;  %v1316_v49 = vrot.slane %v1945_v61, %v2310_v8  ;;  %v1312_v3 = vrot.slane %v1945_v61, %v2300_v4  ;;  %v1320_v15 = vrot.slane %v1945_v61, %v2313_v9  ;;  %v1406_v8 = vpop.permute.xlu1 %1405 }
 0x4c6   : > { %v1328_v6 = vrot.slane %v1945_v61, %v2338_v19  ;;  %v1332_v54 = vrot.slane %v1945_v61, %v2354_v25  ;;  %v1336_v4 = vrot.slane %v1945_v61, %v2358_v27  ;;  %v1340_v9 = vrot.slane %v1945_v61, %v2367_v30  ;;  %v456_v30 = vld [vmem:[%s2700_s9 + $0x18] sm:$0xff] }
 0x4c7   : > { %v1350_v28 = vmul.f32 %v2545_v60, %v1316_v49  ;;  %v1349_v34 = vmul.f32 %v2540_v20, %v1312_v3  ;;  %v1352_v12 = vmul.f32 %v1935_v5, %v1324_v0  ;;  %v1351_v17 = vmul.f32 %v2549_v62, %v1320_v15  ;;  %1827 = vmatpush3.msra.mxu1 %v456_v30 }
 0x4c8   : > { %v1353_v60 = vmul.f32 %v2552_v45, %v1328_v6  ;;  %v1354_v20 = vmul.f32 %v2555_v10, %v1332_v54  ;;  %v1355_v22 = vmul.f32 %v2558_v43, %v1336_v4  ;;  %v1356_v62 = vmul.f32 %v2561_v11, %v1340_v9  ;;  %v455_v45 = vld [vmem:[%s2700_s9 + $0x10] sm:$0xff]  ;;  %1828 = vmatprep.subr.mxu1 %v2077_v2  ;;  %v454_v10 = vld [vmem:[%s2700_s9 + $0x8] sm:$0xff]  ;;  %v453_v43 = vld [vmem:[%s2700_s9] sm:$0xff] }
 0x4c9   : > { %v1423_v13 = vmul.f32 %v1371_v26, %v1350_v28  ;;  %v1422_v42 = vmul.f32 %v1364_v55, %v1349_v34  ;;  %v1425_v16 = vmul.f32 %v1385_v58, %v1352_v12  ;;  %v1424_v19 = vmul.f32 %v1378_v56, %v1351_v17  ;;  %v1413_v33 = vpop.permute.xlu1 %1412  ;;  %1829 = vmatpush3.msra.mxu1 %v455_v45 }
 0x4ca   : > { %v1426_v25 = vmul.f32 %v1392_v14, %v1353_v60  ;;  %v1427_v5 = vmul.f32 %v1399_v59, %v1354_v20  ;;  %v1428_v27 = vmul.f32 %v1406_v8, %v1355_v22  ;;  %v1429_v35 = vmul.f32 %v1413_v33, %v1356_v62  ;;  %1830 = vmatprep.subr.mxu1 %v2077_v2 }
 0x4cb   : > { %1437 = vperm.xlu1 %1895, %v1423_v13   ;;  %1432 = vperm.xlu0 %1894, %v1422_v42  }
 0x4cc   : > { %1831 = vmatpush3.msra.mxu1 %v454_v10 }
 0x4cd   : > { %1832 = vmatprep.subr.mxu1 %v2077_v2 }
 0x4ce   : > { %1833 = vmatpush3.msra.mxu1 %v453_v43 }
 0x4cf   : > { %1442 = vperm.xlu0 %1894, %v1424_v19   ;;  %1447 = vperm.xlu1 %1895, %v1425_v16  }
 0x4d3   : > { %1452 = vperm.xlu0 %1894, %v1426_v25   ;;  %1457 = vperm.xlu1 %1895, %v1427_v5  }
 0x4d7   : > { %1462 = vperm.xlu0 %1894, %v1428_v27   ;;  %1467 = vperm.xlu1 %1895, %v1429_v35  }
 0x546   : > { %v1433_v11 = vpop.permute.xlu0 %1432  ;;  %v1438_v36 = vpop.permute.xlu1 %1437 }
 0x547   : > { %v1470_v37 = vmul.f32 %v1433_v11, %v2426_v63  ;;  %v1471_v38 = vmul.f32 %v1438_v36, %v2428_v1 }
 0x549   : > { %v1478_v23 = vsel %vm550_vm1, %v1470_v37, 0.0  ;;  %v1485_v39 = vsel %vm550_vm1, %v1471_v38, 0.0 }
 0x54a   : > { %v1479_v40 = vrot.slane %v1478_v23, 4  ;;  %v1486_v29 = vrot.slane %v1485_v39, 4  ;;  %v1443_v32 = vpop.permute.xlu0 %1442  ;;  %v1448_v44 = vpop.permute.xlu1 %1447 }
 0x54b   : > { %v1472_v46 = vmul.f32 %v1443_v32, %v2430_v7  ;;  %v1473_v47 = vmul.f32 %v1448_v44, %v2439_v18 }
 0x54c   : > { %v1480_v2 = vadd.f32 %v1479_v40, %v1478_v23  ;;  %v1487_v48 = vadd.f32 %v1486_v29, %v1485_v39 }
 0x54d   : > { %v1492_v50 = vsel %vm550_vm1, %v1472_v46, 0.0  ;;  %v1499_v63 = vsel %vm550_vm1, %v1473_v47, 0.0 }
 0x54e   : > { %v1481_v51 = vrot.slane %v1480_v2, 2  ;;  %v1488_v1 = vrot.slane %v1487_v48, 2  ;;  %v1493_v52 = vrot.slane %v1492_v50, 4  ;;  %v1500_v53 = vrot.slane %v1499_v63, 4  ;;  %v1453_v55 = vpop.permute.xlu0 %1452  ;;  %v1458_v56 = vpop.permute.xlu1 %1457 }
 0x54f   : > { %v1474_v57 = vmul.f32 %v1453_v55, %v2442_v21  ;;  %v1475_v58 = vmul.f32 %v1458_v56, %v2448_v24 }
 0x550   : > { %v1482_v14 = vadd.f32 %v1481_v51, %v1480_v2  ;;  %v1489_v7 = vadd.f32 %v1488_v1, %v1487_v48  ;;  %v1494_v61 = vadd.f32 %v1493_v52, %v1492_v50  ;;  %v1501_v18 = vadd.f32 %v1500_v53, %v1499_v63 }
 0x551   : > { %v1506_v0 = vsel %vm550_vm1, %v1474_v57, 0.0  ;;  %v1513_v49 = vsel %vm550_vm1, %v1475_v58, 0.0 }
 0x552   : > { %v1483_v3 = vrot.slane %v1482_v14, 1  ;;  %v1490_v15 = vrot.slane %v1489_v7, 1  ;;  %v1495_v59 = vrot.slane %v1494_v61, 2  ;;  %v1502_v26 = vrot.slane %v1501_v18, 2  ;;  %v1463_v28 = vpop.permute.xlu0 %1462  ;;  %v1468_v34 = vpop.permute.xlu1 %1467 }
 0x553   : > { %v1507_v6 = vrot.slane %v1506_v0, 4  ;;  %v1514_v54 = vrot.slane %v1513_v49, 4  ;;  %v1476_v21 = vmul.f32 %v1463_v28, %v2450_v31  ;;  %v1477_v24 = vmul.f32 %v1468_v34, %v2456_v41 }
 0x554   : > { %v1484_v12 = vadd.f32 %v1483_v3, %v1482_v14  ;;  %v1496_v13 = vadd.f32 %v1495_v59, %v1494_v61  ;;  %v1503_v42 = vadd.f32 %v1502_v26, %v1501_v18  ;;  %v1491_v16 = vadd.f32 %v1490_v15, %v1489_v7 }
 0x555   : > { %v1508_v17 = vadd.f32 %v1507_v6, %v1506_v0  ;;  %v1515_v4 = vadd.f32 %v1514_v54, %v1513_v49  ;;  %v1520_v8 = vsel %vm550_vm1, %v1476_v21, 0.0  ;;  %v1527_v9 = vsel %vm550_vm1, %v1477_v24, 0.0 }
 0x556   : > { %v1497_v60 = vrot.slane %v1496_v13, 1  ;;  %v1504_v20 = vrot.slane %v1503_v42, 1  ;;  %v1521_v19 = vrot.slane %v1520_v8, 4  ;;  %v1528_v22 = vrot.slane %v1527_v9, 4 }
 0x557   : > { %v1509_v25 = vrot.slane %v1508_v17, 2  ;;  %v1516_v5 = vrot.slane %v1515_v4, 2  ;;  %v1542_v35 = vsel %vm1148_vm2, %v1491_v16, %v1484_v12 }
 0x558   : > { %v1498_v62 = vadd.f32 %v1497_v60, %v1496_v13  ;;  %v1522_v31 = vadd.f32 %v1521_v19, %v1520_v8  ;;  %v1529_v27 = vadd.f32 %v1528_v22, %v1527_v9  ;;  %v1505_v30 = vadd.f32 %v1504_v20, %v1503_v42 }
 0x559   : > { %v1510_v33 = vadd.f32 %v1509_v25, %v1508_v17  ;;  %v1517_v41 = vadd.f32 %v1516_v5, %v1515_v4 }
 0x55a   : > { %v1523_v45 = vrot.slane %v1522_v31, 2  ;;  %v1543_v10 = vsel %vm1150_vm3, %v1498_v62, %v1542_v35  ;;  %v1530_v36 = vrot.slane %v1529_v27, 2 }
 0x55b   : > { %v1511_v43 = vrot.slane %v1510_v33, 1  ;;  %v1518_v11 = vrot.slane %v1517_v41, 1  ;;  %v1544_v40 = vsel %vm1152_vm4, %v1505_v30, %v1543_v10 }
 0x55c   : > { %v1524_v37 = vadd.f32 %v1523_v45, %v1522_v31  ;;  %v1531_v39 = vadd.f32 %v1530_v36, %v1529_v27 }
 0x55d   : > { %v1512_v38 = vadd.f32 %v1511_v43, %v1510_v33  ;;  %v1519_v23 = vadd.f32 %v1518_v11, %v1517_v41 }
 0x55e   : > { %v1525_v29 = vrot.slane %v1524_v37, 1  ;;  %v1532_v44 = vrot.slane %v1531_v39, 1 }
 0x55f   : > { %v1545_v32 = vsel %vm1154_vm5, %v1512_v38, %v1544_v40 }
 0x560   : > { %v1526_v46 = vadd.f32 %v1525_v29, %v1524_v37  ;;  %v1533_v47 = vadd.f32 %v1532_v44, %v1531_v39  ;;  %v1546_v2 = vsel %vm1156_vm6, %v1519_v23, %v1545_v32 }
 0x562   : > { %v1547_v48 = vsel %vm1158_vm7, %v1526_v46, %v1546_v2 }
 0x563   : > { %v1548_v50 = vsel %vm1160_vm8, %v1533_v47, %v1547_v48 }
 0x564   : > { %1835 = vmatmul.mubr.msk.f32.vlgmr.msra.gmra.mxu1 %vm550_vm1, %v1548_v50 }
 0x624   : > { %v1617_v63 = vpop.f32.mrf.mxu1 }
 0x625   : > { %1622 = vst.msk [vmem:[%s427_s19] sm:$0xff] %vm1621_vm10, %v1617_v63 }
 0x626   : > { %v1836_v51 = vpop.f32.mrf.mxu1 }
 0x627   : > { %2015 = shalt.err (!%p2012_p3)
}
 0x628   : > { %s2016_s29 = scalar_lea.hbm %s2648_s18, 128  ;;  %s2020_s20 = scalar_lea.hbm %s2727_s22, 256 }
 0x629   : > { %p2017_p5 = scmp.ne.s32.totalorder %s2648_s18, %s2016_s29  ;;  %p2021_p7 = scmp.lt.s32.totalorder %s2648_s18, %s2727_s22 }
 0x62a   : > { %p2022_p1 = scmp.lt.s32.totalorder %s2020_s20, %s2016_s29 }
 0x62b   : > { %p2018_p11 = pnand %p2017_p5, %p2728_p9 }
 0x62c   : > { %p2023_p6 = por %p2022_p1, %p2021_p7 }
 0x62d   : > { %p2019_p12 = pneg %p2018_p11 }
 0x62f   : > { %p2024_p13 = pnand %p2023_p6, %p2019_p12 }
 0x631   : > { %2027 = shalt.err (!%p2024_p13)
}
 0x632   : > { %1841 = dma.vmem_to_hbm [thread:$0]  (%p2728_p9), %s2650_s21, 128, %s2648_s18, %s1624_s28  }
 0x633 PF: > { %s2729_s30 = sld [smem:[#allocation11_spill]]  ;;  %p2732_p10 = scmp.ge.s32.totalorder %s2070_s16, 2 }
 0x634   : > { %s2730_s0 = sld [smem:[#allocation15_spill]] }
 0x639   : > { %s1649_s19 = sand.u32 1, %s2729_s30  }
 0x63a   : > { %p2731_p8 = scmp.ne.s32.totalorder %s2730_s0, 0  ;;  %s1650_s27 = scalar_lea.sflag [#allocation4], %s1649_s19 }
 0x63c   : > { %p1851_p0 = pnand %p2732_p10, %p2731_p8 }
 0x63e   : > { %p1852_p2 = pneg %p1851_p0 }
 0x640   : > { %2053 = dma.done.wait (%p1852_p2), %s1650_s27, 128  }
 0x641   : > { %2055 = vsyncadd (%p1852_p2), %s1650_s27, 4294967168  ;;  %s2733_s16 = sld [smem:[#allocation13_spill]]  ;;  %s2736_s13 = smov %s2062_s14 }
 0x642   : > { %s2734_s12 = sld [smem:[#allocation12_spill]] }
 0x643   : > { %s2735_s15 = sld [smem:[#allocation14_spill]] }
 0x647   : > { %p26_p4 = scmp.ge.s32.totalorder %s2733_s16, 4  }
 0x648   : > { %s2737_s14 = smov %s2734_s12 }
 0x649   :  { %28 = sbr.rel (!%p26_p4) target bundleno = 10 (0xa), region = 121 }
 0x64e   :  { %1655 = vsyncpa [#allocation3], 1 }
 0x64f   :  { %1657 = vsyncpa [#allocation3 + $0x1], 1 }
 0x650   :  { %1658 = vsyncpa [#allocation6], 1 }
 0x651   :  { %1660 = vsyncpa [#allocation6 + $0x1], 1 }
 0x652   :  { %1661 = vsyncpa [#allocation4], 1 }
 0x653   :  { %1663 = vsyncpa [#allocation4 + $0x1], 1 }

</bundles_post_ra>
